<compile_context>
chip_gen: v6e
topology: v6e:2x2x1
jax: 0.10.0
libtpu: 0.0.40
codegen_flags: <defaults>
</compile_context>

<pallas_src>
import jax
import jax.numpy as jnp
from jax.experimental import pallas as pl
from jax.experimental.pallas import tpu as pltpu

_VMEM_LIMIT = 32 * 1024 * 1024    # scoped-VMEM cap, safe on v5e/v6e/v7x
_VMEM_BUDGET = 20 * 1024 * 1024   # budget for one kernel-1 step's live buffers


def _round_up(x, m):
    return (x + m - 1) // m * m


def _make_matmul_stats_kernel(tiles_per_slice, k_rows):
    """Per tile: Y = W_big @ P, zero out-of-range phase entries, store Y and
    accumulate per-row sum / sum-of-squares; lane-reduce once per slice."""

    def kernel(w_ref, p_ref, sel_ref, y_ref, ssum_ref, ssq_ref, acc_s, acc_q):
        j = pl.program_id(1)

        @pl.when(j == 0)
        def _():
            acc_s[...] = jnp.zeros_like(acc_s)
            acc_q[...] = jnp.zeros_like(acc_q)

        # (4*Cout, K+2) @ (K+2, tm).  The two trailing rows of P carry the
        # column clip flags and meet all-zero weight columns (no effect on y).
        y = jnp.dot(w_ref[...], p_ref[...], preferred_element_type=jnp.float32)

        mb = p_ref[k_rows:k_rows + 1, :]       # (1, tm)  1.0 where col b clipped
        ma = p_ref[k_rows + 1:k_rows + 2, :]   # (1, tm)  1.0 where row a clipped
        sel_b = sel_ref[:, 0:1]                # (4*Cout, 1) phase uses shifted col
        sel_a = sel_ref[:, 1:2]                # (4*Cout, 1) phase uses shifted row
        y = y * (1.0 - sel_b * mb) * (1.0 - sel_a * ma)

        y_ref[...] = y                         # lane-dense, unmasked vst
        acc_s[...] += y                        # plain VPU adds per step
        acc_q[...] += y * y

        @pl.when(j == tiles_per_slice - 1)
        def _():
            ssum_ref[...] = jnp.sum(acc_s[...], axis=1, keepdims=True)[None]
            ssq_ref[...] = jnp.sum(acc_q[...], axis=1, keepdims=True)[None]

    return kernel


def _bn_relu_kernel(y_ref, scale_ref, shift_ref, o_ref):
    o_ref[...] = jnp.maximum(y_ref[...] * scale_ref[...] + shift_ref[...], 0.0)


def deconv_block(x, w_t, bias, gamma, beta, *, stride=2, padding=1,
                 output_padding=0, eps=1e-5, tm=4096, n_slices=1):
    """ConvTranspose2d(k=3,s=2,p=1,op in {0,1}) + BatchNorm2d(train) + ReLU.

    x:    (N, Cin, H, W)  float32
    w_t:  (Cin, Cout, 3, 3)  PyTorch ConvTranspose2d weight layout
    bias: (Cout,) — unused: BatchNorm removes per-channel constants exactly.
    gamma/beta: (Cout,)
    returns: (N, Cout, Hout, Wout), Hout = (H-1)*s - 2p + k + op
    """
    del bias  # BN (training mode) makes the conv bias a mathematical no-op.

    N, Cin, H, W = x.shape
    Cin_w, Cout, kh, kw = w_t.shape
    assert Cin_w == Cin and kh == kw == 3, "phase decomposition written for k=3"
    assert stride == 2 and padding == 1, "phase decomposition written for s=2, p=1"
    assert output_padding in (0, 1)
    assert n_slices >= 1
    Hout = (H - 1) * stride - 2 * padding + kh + output_padding
    Wout = (W - 1) * stride - 2 * padding + kw + output_padding

    f32 = jnp.float32
    K4 = 4 * Cin          # 4 shifted input views, channel-stacked (matmul K)
    C4 = 4 * Cout         # 4 output sub-pixel phases, channel-stacked (rows)
    M_in = N * H * W      # one column per input pixel
    M_out = N * Hout * Wout   # true output-element count (for BN stats)

    # ---- glue: 4 shifted views of x (no dilation, no 9x im2col) ----
    xe = jnp.pad(x.astype(f32), ((0, 0), (0, 0), (0, 1), (0, 1)))
    views = jnp.concatenate(
        [xe[:, :, :H, :W], xe[:, :, :H, 1:W + 1],
         xe[:, :, 1:H + 1, :W], xe[:, :, 1:H + 1, 1:W + 1]],
        axis=1)                                        # (N, 4*Cin, H, W)
    p_t = views.transpose(1, 0, 2, 3).reshape(K4, M_in)

    # phase-stacked weight (4*Cout, 4*Cin); rows = phase*Cout + o,
    # cols = view*Cin + c, views ordered [v00, v01(+1 col), v10(+1 row), v11].
    w32 = w_t.astype(f32)
    tap = lambda i, j: w32[:, :, i, j].T               # (Cout, Cin)
    z = jnp.zeros((Cout, Cin), f32)
    w_big = jnp.block([
        [tap(1, 1), z,         z,         z],          # phase (even, even)
        [tap(1, 2), tap(1, 0), z,         z],          # phase (even, odd )
        [tap(2, 1), z,         tap(0, 1), z],          # phase (odd , even)
        [tap(2, 2), tap(2, 0), tap(0, 2), tap(0, 0)],  # phase (odd , odd )
    ])

    # ---- tiling: large lane tiles, adaptive to VMEM budget / problem size ----
    per_col_bytes = 4 * (2 * (K4 + 2) + 4 * C4)        # dbl-buf P & Y + 2 accum
    tm_cap = max(512, (_VMEM_BUDGET // per_col_bytes) // 512 * 512)
    per_slice = -(-M_in // n_slices)
    tm = max(512, min(_round_up(tm, 512), tm_cap, _round_up(per_slice, 512)))
    M_pad = _round_up(M_in, tm * n_slices)
    n_tiles = M_pad // tm
    tiles_per_slice = n_tiles // n_slices

    # per-column clip flags (2 rows) appended to P; they hit all-zero weight
    # columns in the matmul and are read back as the validity mask.
    m = jnp.arange(M_in)
    b_idx = m % W
    a_idx = (m // W) % H
    mask = jnp.stack([(2 * b_idx + 1 >= Wout).astype(f32),
                      (2 * a_idx + 1 >= Hout).astype(f32)], axis=0)   # (2, M_in)
    p_aug = jnp.concatenate([p_t, mask], axis=0)
    p_aug = jnp.pad(p_aug, ((0, 0), (0, M_pad - M_in)))
    w_aug = jnp.concatenate([w_big, jnp.zeros((C4, 2), f32)], axis=1)  # (C4, K4+2)

    # per-row phase selectors: (uses shifted col, uses shifted row)
    sel = jnp.repeat(jnp.array([[0., 0.], [1., 0.], [0., 1.], [1., 1.]], f32),
                     Cout, axis=0)                                     # (C4, 2)

    # ---- kernel 1: fused 4-phase matmul + masking + per-channel stats ----
    y_ph, psum, psq = pl.pallas_call(
        _make_matmul_stats_kernel(tiles_per_slice, K4),
        out_shape=(
            jax.ShapeDtypeStruct((C4, M_pad), f32),
            jax.ShapeDtypeStruct((n_slices, C4, 1), f32),
            jax.ShapeDtypeStruct((n_slices, C4, 1), f32),
        ),
        grid_spec=pltpu.PrefetchScalarGridSpec(
            num_scalar_prefetch=0,
            grid=(n_slices, tiles_per_slice),
            in_specs=[
                pl.BlockSpec((C4, K4 + 2), lambda i, j: (0, 0)),
                pl.BlockSpec((K4 + 2, tm), lambda i, j: (0, i * tiles_per_slice + j)),
                pl.BlockSpec((C4, 2), lambda i, j: (0, 0)),
            ],
            out_specs=(
                pl.BlockSpec((C4, tm), lambda i, j: (0, i * tiles_per_slice + j)),
                pl.BlockSpec((1, C4, 1), lambda i, j: (i, 0, 0)),
                pl.BlockSpec((1, C4, 1), lambda i, j: (i, 0, 0)),
            ),
            scratch_shapes=[pltpu.VMEM((C4, tm), f32),
                            pltpu.VMEM((C4, tm), f32)],
        ),
        compiler_params=pltpu.CompilerParams(
            # On v7x pass n_slices=2 and, if profiling shows one idle core,
            # switch axis 0 to pltpu.CORE_PARALLEL.
            dimension_semantics=("parallel", "arbitrary"),
            vmem_limit_bytes=_VMEM_LIMIT),
    )(w_aug, p_aug, sel)

    # ---- glue: BN (training mode, biased variance) folded into scale/shift.
    #      Masked / padded columns contribute exactly 0 -> divide by true M_out.
    ssum = psum.sum(axis=0).reshape(4, Cout).sum(axis=0)
    ssq = psq.sum(axis=0).reshape(4, Cout).sum(axis=0)
    mean = ssum / M_out
    var = ssq / M_out - mean * mean
    scale = gamma.astype(f32) / jnp.sqrt(var + eps)
    shift = beta.astype(f32) - mean * scale
    scale_r = jnp.tile(scale, 4).reshape(C4, 1)
    shift_r = jnp.tile(shift, 4).reshape(C4, 1)

    # ---- kernel 2: affine + ReLU, in place over the phase-major buffer ----
    out_ph = pl.pallas_call(
        _bn_relu_kernel,
        out_shape=jax.ShapeDtypeStruct((C4, M_pad), f32),
        grid_spec=pltpu.PrefetchScalarGridSpec(
            num_scalar_prefetch=0,
            grid=(n_tiles,),
            in_specs=[
                pl.BlockSpec((C4, tm), lambda i: (0, i)),
                pl.BlockSpec((C4, 1), lambda i: (0, 0)),
                pl.BlockSpec((C4, 1), lambda i: (0, 0)),
            ],
            out_specs=pl.BlockSpec((C4, tm), lambda i: (0, i)),
        ),
        compiler_params=pltpu.CompilerParams(
            dimension_semantics=("parallel",),
            vmem_limit_bytes=_VMEM_LIMIT),
        input_output_aliases={0: 0},
    )(y_ph, scale_r, shift_r)

    # ---- glue: phase interleave -> NCHW (single transpose+slice pass) ----
    y6 = out_ph[:, :M_in].reshape(2, 2, Cout, N, H, W)       # (si, sj, o, n, a, b)
    full = jnp.transpose(y6, (3, 2, 4, 0, 5, 1)).reshape(N, Cout, 2 * H, 2 * W)
    return full[:, :, :Hout, :Wout]


def _reference(x, w_t, bias, gamma, beta, *, stride=2, padding=1,
               output_padding=0, eps=1e-5):
    k = w_t.shape[2]
    s, p, op = stride, padding, output_padding
    w_conv = jnp.transpose(w_t[:, :, ::-1, ::-1], (1, 0, 2, 3))   # (Cout, Cin, k, k)
    y = jax.lax.conv_general_dilated(
        x, w_conv, window_strides=(1, 1),
        padding=[(k - 1 - p, k - 1 - p + op)] * 2,
        lhs_dilation=(s, s),
        dimension_numbers=("NCHW", "OIHW", "NCHW"))
    y = y + bias[None, :, None, None]
    mean = jnp.mean(y, axis=(0, 2, 3), keepdims=True)
    var = jnp.var(y, axis=(0, 2, 3), keepdims=True)
    yh = (y - mean) / jnp.sqrt(var + eps)
    yh = yh * gamma[None, :, None, None] + beta[None, :, None, None]
    return jnp.maximum(yh, 0.0)


if __name__ == "__main__":
    N, Cin, Cout, H, W = 2, 4, 8, 16, 16
    k = 3

    key = jax.random.PRNGKey(0)
    k1, k2, k3, k4, k5 = jax.random.split(key, 5)
    x = jax.random.normal(k1, (N, Cin, H, W), dtype=jnp.float32)
    w_t = 0.1 * jax.random.normal(k2, (Cin, Cout, k, k), dtype=jnp.float32)
    bias = 0.1 * jax.random.normal(k3, (Cout,), dtype=jnp.float32)
    gamma = 1.0 + 0.1 * jax.random.normal(k4, (Cout,), dtype=jnp.float32)
    beta = 0.1 * jax.random.normal(k5, (Cout,), dtype=jnp.float32)

    fwd = jax.jit(deconv_block)
    out = jax.block_until_ready(fwd(x, w_t, bias, gamma, beta))

    ref = _reference(x, w_t, bias, gamma, beta)
    assert out.shape == (N, Cout, 2 * H - 1, 2 * W - 1), out.shape
    err = float(jnp.max(jnp.abs(out - ref)))
    assert jnp.allclose(out, ref, rtol=1e-4, atol=1e-4), err

    print("KERNEL_OK")
</pallas_src>

<mosaic_0001>
module attributes {stable_mosaic.version = 11 : i64} {
  func.func @kernel(%arg0: i32, %arg1: i32, %arg2: memref<32x18xf32, #tpu.memory_space<vmem>>, %arg3: memref<18x512xf32, #tpu.memory_space<vmem>>, %arg4: memref<32x2xf32, #tpu.memory_space<vmem>>, %arg5: memref<32x512xf32, #tpu.memory_space<vmem>>, %arg6: memref<1x32x1xf32, #tpu.memory_space<vmem>>, %arg7: memref<1x32x1xf32, #tpu.memory_space<vmem>>, %arg8: memref<32x512xf32, #tpu.memory_space<vmem>>, %arg9: memref<32x512xf32, #tpu.memory_space<vmem>>) attributes {dimension_semantics = [#tpu.dimension_semantics<parallel>, #tpu.dimension_semantics<arbitrary>], iteration_bounds = array<i64: 1, 1>, scalar_prefetch = 0 : i64, scratch_operands = 2 : i64, tpu.core_type = #tpu.core_type<tc>, window_params = [{pipeline_mode = #tpu.pipeline_mode<synchronous>, transform_indices = @transform_0, window_bounds = array<i64: 32, 18>}, {transform_indices = @transform_1, window_bounds = array<i64: 18, 512>}, {pipeline_mode = #tpu.pipeline_mode<synchronous>, transform_indices = @transform_2, window_bounds = array<i64: 32, 2>}, {transform_indices = @transform_3, window_bounds = array<i64: 32, 512>}, {transform_indices = @transform_4, window_bounds = array<i64: 1, 32, 1>}, {transform_indices = @transform_5, window_bounds = array<i64: 1, 32, 1>}]} {
    %c0_i32 = arith.constant 0 : i32
    %0 = arith.cmpi eq, %arg1, %c0_i32 : i32
    %1 = arith.extui %0 : i1 to i32
    %c0_i32_0 = arith.constant 0 : i32
    %2 = arith.cmpi ne, %1, %c0_i32_0 : i32
    scf.if %2 {
      %cst_23 = arith.constant 0.000000e+00 : f32
      %33 = vector.broadcast %cst_23 : f32 to vector<32x512xf32>
      %c0_24 = arith.constant 0 : index
      %c0_25 = arith.constant 0 : index
      %34 = vector.load %arg8[%c0_24, %c0_25] : memref<32x512xf32, #tpu.memory_space<vmem>>, vector<32x512xf32>
      tpu.vector_store %arg8[%c0_24, %c0_25], %33 {strides = array<i32>} : memref<32x512xf32, #tpu.memory_space<vmem>>, vector<32x512xf32>,
      %cst_26 = arith.constant 0.000000e+00 : f32
      %35 = vector.broadcast %cst_26 : f32 to vector<32x512xf32>
      %c0_27 = arith.constant 0 : index
      %c0_28 = arith.constant 0 : index
      %36 = vector.load %arg9[%c0_27, %c0_28] : memref<32x512xf32, #tpu.memory_space<vmem>>, vector<32x512xf32>
      tpu.vector_store %arg9[%c0_27, %c0_28], %35 {strides = array<i32>} : memref<32x512xf32, #tpu.memory_space<vmem>>, vector<32x512xf32>,
    } else {
    }
    %c0 = arith.constant 0 : index
    %c0_1 = arith.constant 0 : index
    %3 = vector.load %arg2[%c0, %c0_1] : memref<32x18xf32, #tpu.memory_space<vmem>>, vector<32x18xf32>
    %c0_2 = arith.constant 0 : index
    %c0_3 = arith.constant 0 : index
    %4 = vector.load %arg3[%c0_2, %c0_3] : memref<18x512xf32, #tpu.memory_space<vmem>>, vector<18x512xf32>
    %cst = arith.constant dense<0.000000e+00> : vector<32x512xf32>
    %5 = tpu.matmul %3, %4, %cst {dimension_numbers = #tpu.dot_dimension_numbers<[1], [0], [0], [1], [0, 0, 1, 1], [], []>} : vector<32x18xf32>, vector<18x512xf32>, vector<32x512xf32> -> vector<32x512xf32>
    %c16 = arith.constant 16 : index
    %c0_4 = arith.constant 0 : index
    %6 = vector.load %arg3[%c16, %c0_4] : memref<18x512xf32, #tpu.memory_space<vmem>>, vector<1x512xf32>
    %c17 = arith.constant 17 : index
    %c0_5 = arith.constant 0 : index
    %7 = vector.load %arg3[%c17, %c0_5] : memref<18x512xf32, #tpu.memory_space<vmem>>, vector<1x512xf32>
    %c0_6 = arith.constant 0 : index
    %c0_7 = arith.constant 0 : index
    %8 = vector.load %arg4[%c0_6, %c0_7] : memref<32x2xf32, #tpu.memory_space<vmem>>, vector<32x1xf32>
    %c0_8 = arith.constant 0 : index
    %c1 = arith.constant 1 : index
    %9 = vector.load %arg4[%c0_8, %c1] : memref<32x2xf32, #tpu.memory_space<vmem>>, vector<32x1xf32>
    %10 = vector.broadcast %8 : vector<32x1xf32> to vector<32x512xf32>
    %11 = vector.broadcast %6 : vector<1x512xf32> to vector<32x512xf32>
    %12 = arith.mulf %10, %11 : vector<32x512xf32>
    %cst_9 = arith.constant 1.000000e+00 : f32
    %13 = vector.broadcast %cst_9 : f32 to vector<32x512xf32>
    %14 = arith.subf %13, %12 : vector<32x512xf32>
    %15 = arith.mulf %5, %14 : vector<32x512xf32>
    %16 = vector.broadcast %9 : vector<32x1xf32> to vector<32x512xf32>
    %17 = vector.broadcast %7 : vector<1x512xf32> to vector<32x512xf32>
    %18 = arith.mulf %16, %17 : vector<32x512xf32>
    %cst_10 = arith.constant 1.000000e+00 : f32
    %19 = vector.broadcast %cst_10 : f32 to vector<32x512xf32>
    %20 = arith.subf %19, %18 : vector<32x512xf32>
    %21 = arith.mulf %15, %20 : vector<32x512xf32>
    %c0_11 = arith.constant 0 : index
    %c0_12 = arith.constant 0 : index
    %22 = vector.load %arg5[%c0_11, %c0_12] : memref<32x512xf32, #tpu.memory_space<vmem>>, vector<32x512xf32>
    tpu.vector_store %arg5[%c0_11, %c0_12], %21 {strides = array<i32>} : memref<32x512xf32, #tpu.memory_space<vmem>>, vector<32x512xf32>,
    %c0_13 = arith.constant 0 : index
    %c0_14 = arith.constant 0 : index
    %23 = vector.load %arg8[%c0_13, %c0_14] : memref<32x512xf32, #tpu.memory_space<vmem>>, vector<32x512xf32>
    %24 = arith.addf %23, %21 : vector<32x512xf32>
    %c0_15 = arith.constant 0 : index
    %c0_16 = arith.constant 0 : index
    %25 = vector.load %arg8[%c0_15, %c0_16] : memref<32x512xf32, #tpu.memory_space<vmem>>, vector<32x512xf32>
    tpu.vector_store %arg8[%c0_15, %c0_16], %24 {strides = array<i32>} : memref<32x512xf32, #tpu.memory_space<vmem>>, vector<32x512xf32>,
    %c0_17 = arith.constant 0 : index
    %c0_18 = arith.constant 0 : index
    %26 = vector.load %arg9[%c0_17, %c0_18] : memref<32x512xf32, #tpu.memory_space<vmem>>, vector<32x512xf32>
    %27 = arith.mulf %21, %21 : vector<32x512xf32>
    %28 = arith.addf %26, %27 : vector<32x512xf32>
    %c0_19 = arith.constant 0 : index
    %c0_20 = arith.constant 0 : index
    %29 = vector.load %arg9[%c0_19, %c0_20] : memref<32x512xf32, #tpu.memory_space<vmem>>, vector<32x512xf32>
    tpu.vector_store %arg9[%c0_19, %c0_20], %28 {strides = array<i32>} : memref<32x512xf32, #tpu.memory_space<vmem>>, vector<32x512xf32>,
    %c0_i32_21 = arith.constant 0 : i32
    %30 = arith.cmpi eq, %arg1, %c0_i32_21 : i32
    %31 = arith.extui %30 : i1 to i32
    %c0_i32_22 = arith.constant 0 : i32
    %32 = arith.cmpi ne, %31, %c0_i32_22 : i32
    scf.if %32 {
      %c0_23 = arith.constant 0 : index
      %c0_24 = arith.constant 0 : index
      %33 = vector.load %arg8[%c0_23, %c0_24] : memref<32x512xf32, #tpu.memory_space<vmem>>, vector<32x512xf32>
      %cst_25 = arith.constant dense<0.000000e+00> : vector<32xf32>
      %34 = vector.multi_reduction <add>, %33, %cst_25 [1] : vector<32x512xf32> to vector<32xf32>
      %35 = vector.shape_cast %34 : vector<32xf32> to vector<32x1xf32>
      %36 = vector.shape_cast %35 : vector<32x1xf32> to vector<1x32x1xf32>
      %c0_26 = arith.constant 0 : index
      %c0_27 = arith.constant 0 : index
      %c0_28 = arith.constant 0 : index
      %37 = vector.load %arg6[%c0_26, %c0_27, %c0_28] : memref<1x32x1xf32, #tpu.memory_space<vmem>>, vector<1x32x1xf32>
      tpu.vector_store %arg6[%c0_26, %c0_27, %c0_28], %36 {strides = array<i32>} : memref<1x32x1xf32, #tpu.memory_space<vmem>>, vector<1x32x1xf32>,
      %c0_29 = arith.constant 0 : index
      %c0_30 = arith.constant 0 : index
      %38 = vector.load %arg9[%c0_29, %c0_30] : memref<32x512xf32, #tpu.memory_space<vmem>>, vector<32x512xf32>
      %cst_31 = arith.constant dense<0.000000e+00> : vector<32xf32>
      %39 = vector.multi_reduction <add>, %38, %cst_31 [1] : vector<32x512xf32> to vector<32xf32>
      %40 = vector.shape_cast %39 : vector<32xf32> to vector<32x1xf32>
      %41 = vector.shape_cast %40 : vector<32x1xf32> to vector<1x32x1xf32>
      %c0_32 = arith.constant 0 : index
      %c0_33 = arith.constant 0 : index
      %c0_34 = arith.constant 0 : index
      %42 = vector.load %arg7[%c0_32, %c0_33, %c0_34] : memref<1x32x1xf32, #tpu.memory_space<vmem>>, vector<1x32x1xf32>
      tpu.vector_store %arg7[%c0_32, %c0_33, %c0_34], %41 {strides = array<i32>} : memref<1x32x1xf32, #tpu.memory_space<vmem>>, vector<1x32x1xf32>,
    } else {
    }
    return
  }
  func.func @transform_0(%arg0: i32, %arg1: i32) -> (i32, i32) {
    %c0_i32 = arith.constant 0 : i32
    %c0_i32_0 = arith.constant 0 : i32
    %c0_i32_1 = arith.constant 0 : i32
    return %c0_i32, %c0_i32_0 : i32, i32
  }
  func.func @transform_1(%arg0: i32, %arg1: i32) -> (i32, i32) {
    %c1_i32 = arith.constant 1 : i32
    %0 = arith.muli %arg0, %c1_i32 : i32
    %1 = arith.addi %0, %arg1 : i32
    %c0_i32 = arith.constant 0 : i32
    %c0_i32_0 = arith.constant 0 : i32
    return %c0_i32, %1 : i32, i32
  }
  func.func @transform_2(%arg0: i32, %arg1: i32) -> (i32, i32) {
    %c0_i32 = arith.constant 0 : i32
    %c0_i32_0 = arith.constant 0 : i32
    %c0_i32_1 = arith.constant 0 : i32
    return %c0_i32, %c0_i32_0 : i32, i32
  }
  func.func @transform_3(%arg0: i32, %arg1: i32) -> (i32, i32) {
    %c1_i32 = arith.constant 1 : i32
    %0 = arith.muli %arg0, %c1_i32 : i32
    %1 = arith.addi %0, %arg1 : i32
    %c0_i32 = arith.constant 0 : i32
    %c0_i32_0 = arith.constant 0 : i32
    return %c0_i32, %1 : i32, i32
  }
  func.func @transform_4(%arg0: i32, %arg1: i32) -> (i32, i32, i32) {
    %c0_i32 = arith.constant 0 : i32
    %c0_i32_0 = arith.constant 0 : i32
    %c0_i32_1 = arith.constant 0 : i32
    return %arg0, %c0_i32, %c0_i32_0 : i32, i32, i32
  }
  func.func @transform_5(%arg0: i32, %arg1: i32) -> (i32, i32, i32) {
    %c0_i32 = arith.constant 0 : i32
    %c0_i32_0 = arith.constant 0 : i32
    %c0_i32_1 = arith.constant 0 : i32
    return %arg0, %c0_i32, %c0_i32_0 : i32, i32, i32
  }
}

module attributes {stable_mosaic.version = 11 : i64} {
  func.func @_bn_relu_kernel(%arg0: i32, %arg1: memref<32x512xf32, #tpu.memory_space<vmem>>, %arg2: memref<32x1xf32, #tpu.memory_space<vmem>>, %arg3: memref<32x1xf32, #tpu.memory_space<vmem>>, %arg4: memref<32x512xf32, #tpu.memory_space<vmem>>) attributes {dimension_semantics = [#tpu.dimension_semantics<parallel>], iteration_bounds = array<i64: 1>, scalar_prefetch = 0 : i64, scratch_operands = 0 : i64, tpu.core_type = #tpu.core_type<tc>, window_params = [{transform_indices = @transform_0, window_bounds = array<i64: 32, 512>}, {pipeline_mode = #tpu.pipeline_mode<synchronous>, transform_indices = @transform_1, window_bounds = array<i64: 32, 1>}, {pipeline_mode = #tpu.pipeline_mode<synchronous>, transform_indices = @transform_2, window_bounds = array<i64: 32, 1>}, {transform_indices = @transform_3, window_bounds = array<i64: 32, 512>}]} {
    %c0 = arith.constant 0 : index
    %c0_0 = arith.constant 0 : index
    %0 = vector.load %arg1[%c0, %c0_0] : memref<32x512xf32, #tpu.memory_space<vmem>>, vector<32x512xf32>
    %c0_1 = arith.constant 0 : index
    %c0_2 = arith.constant 0 : index
    %1 = vector.load %arg2[%c0_1, %c0_2] : memref<32x1xf32, #tpu.memory_space<vmem>>, vector<32x1xf32>
    %2 = vector.broadcast %1 : vector<32x1xf32> to vector<32x512xf32>
    %3 = arith.mulf %0, %2 : vector<32x512xf32>
    %c0_3 = arith.constant 0 : index
    %c0_4 = arith.constant 0 : index
    %4 = vector.load %arg3[%c0_3, %c0_4] : memref<32x1xf32, #tpu.memory_space<vmem>>, vector<32x1xf32>
    %5 = vector.broadcast %4 : vector<32x1xf32> to vector<32x512xf32>
    %6 = arith.addf %3, %5 : vector<32x512xf32>
    %cst = arith.constant 0.000000e+00 : f32
    %7 = vector.broadcast %cst : f32 to vector<32x512xf32>
    %8 = arith.maximumf %6, %7 : vector<32x512xf32>
    %c0_5 = arith.constant 0 : index
    %c0_6 = arith.constant 0 : index
    %9 = vector.load %arg4[%c0_5, %c0_6] : memref<32x512xf32, #tpu.memory_space<vmem>>, vector<32x512xf32>
    tpu.vector_store %arg4[%c0_5, %c0_6], %8 {strides = array<i32>} : memref<32x512xf32, #tpu.memory_space<vmem>>, vector<32x512xf32>,
    return
  }
  func.func @transform_0(%arg0: i32) -> (i32, i32) {
    %c0_i32 = arith.constant 0 : i32
    %c0_i32_0 = arith.constant 0 : i32
    return %c0_i32, %arg0 : i32, i32
  }
  func.func @transform_1(%arg0: i32) -> (i32, i32) {
    %c0_i32 = arith.constant 0 : i32
    %c0_i32_0 = arith.constant 0 : i32
    %c0_i32_1 = arith.constant 0 : i32
    return %c0_i32, %c0_i32_0 : i32, i32
  }
  func.func @transform_2(%arg0: i32) -> (i32, i32) {
    %c0_i32 = arith.constant 0 : i32
    %c0_i32_0 = arith.constant 0 : i32
    %c0_i32_1 = arith.constant 0 : i32
    return %c0_i32, %c0_i32_0 : i32, i32
  }
  func.func @transform_3(%arg0: i32) -> (i32, i32) {
    %c0_i32 = arith.constant 0 : i32
    %c0_i32_0 = arith.constant 0 : i32
    return %c0_i32, %arg0 : i32, i32
  }
}

</mosaic_0001>

<bundles_post_ra>
// kernel: tile.18
= control target key start
LH: loop header
LB: loop body
LE: loop exit
PB: predicated region body
PF: predicated region fallthrough
CT: control target
= control target key end

     0   :  { %s22_s0 = inlined_call_operand.vmem [shape: f32[8], index: 0, kind: input, shape index: {}]   ;;  %s23_s1 = inlined_call_operand.vmem [shape: f32[4,8], index: 1, kind: output, shape index: {}]  }
   0x1   :  { %v4_v0 = vld [vmem:[%s22_s0] ss:$0 sm:$0xff] }
   0x2   :  { %5 = vst [vmem:[%s23_s1] sm:$0xf] %v4_v0 }

// kernel: tile.0
= control target key start
LH: loop header
LB: loop body
LE: loop exit
PB: predicated region body
PF: predicated region fallthrough
CT: control target
= control target key end

     0   :  { %s67_s8 = smov 125   ;;  %vm8_vm0 = vcmask 7168   ;;  %s68_s11 = smov 126   ;;  %s118_s0 = inlined_call_operand.vmem [shape: f32[4,8], index: 0, kind: input, shape index: {}]   ;;  %s119_s1 = inlined_call_operand.vmem [shape: f32[32,1], index: 1, kind: output, shape index: {}]  }
   0x1   :  { %v5_v0 = vld [vmem:[%s118_s0] sm:$0xf]  ;;  %s66_s0 = smov 127   ;;  %s69_s12 = smov 124  }
   0x2   :  { %6 = vst [vmem:[#allocation0] sm:$0xf] %v5_v0  ;;  %s70_s13 = smov 123   ;;  %s71_s14 = smov 122  }
   0x3   :  { %s72_s15 = smov 121  }
   0x9   :  { %v10_v1 = vld [vmem:[#allocation0] sm:$0xf]  }
   0xa   :  { %v22_v2 = vld [vmem:[#allocation0] sm:$0xf]   ;;  %11 = vrot.lane.b32.xlu0 %v10_v1, %s66_s0 }
   0xb   :  { %23 = vrot.lane.b32.xlu1 %v22_v2, %s67_s8  ;;  %v16_v3 = vld [vmem:[#allocation0] sm:$0xf]  }
   0xc   :  { %v28_v4 = vld [vmem:[#allocation0] sm:$0xf]  }
   0xd   :  { %v7_v5 = vld [vmem:[#allocation0] sm:$0xf]  }
   0xe   :  { %9 = vst.msk [vmem:[%s119_s1] ss:$8 sm:$0xf] %vm8_vm0, %v7_v5   ;;  %17 = vrot.lane.b32.xlu0 %v16_v3, %s68_s11  ;;  %v34_v6 = vld [vmem:[#allocation0] sm:$0xf]  }
   0xf   :  { %29 = vrot.lane.b32.xlu1 %v28_v4, %s69_s12  ;;  %v40_v7 = vld [vmem:[#allocation0] sm:$0xf]  }
  0x10   :  { %v46_v8 = vld [vmem:[#allocation0] sm:$0xf]  }
  0x12   :  { %35 = vrot.lane.b32.xlu0 %v34_v6, %s70_s13 }
  0x13   :  { %41 = vrot.lane.b32.xlu1 %v40_v7, %s71_s14 }
  0x16   :  { %47 = vrot.lane.b32.xlu0 %v46_v8, %s72_s15 }
  0x7c   :  { %v12_v9 = vpop.permute.xlu0 %11  }
  0x7d   :  { %v24_v10 = vpop.permute.xlu1 %23   ;;  %52 = vst.msk [vmem:[%s119_s1 + $0x1] ss:$8 sm:$0xf] %vm8_vm0, %v12_v9  }
  0x7e   :  { %54 = vst.msk [vmem:[%s119_s1 + $0x3] ss:$8 sm:$0xf] %vm8_vm0, %v24_v10  }
  0x80   :  { %v18_v11 = vpop.permute.xlu0 %17  }
  0x81   :  { %v30_v12 = vpop.permute.xlu1 %29   ;;  %53 = vst.msk [vmem:[%s119_s1 + $0x2] ss:$8 sm:$0xf] %vm8_vm0, %v18_v11  }
  0x82   :  { %55 = vst.msk [vmem:[%s119_s1 + $0x4] ss:$8 sm:$0xf] %vm8_vm0, %v30_v12  }
  0x84   :  { %v36_v13 = vpop.permute.xlu0 %35  }
  0x85   :  { %v42_v14 = vpop.permute.xlu1 %41   ;;  %56 = vst.msk [vmem:[%s119_s1 + $0x5] ss:$8 sm:$0xf] %vm8_vm0, %v36_v13  }
  0x86   :  { %57 = vst.msk [vmem:[%s119_s1 + $0x6] ss:$8 sm:$0xf] %vm8_vm0, %v42_v14  }
  0x88   :  { %v48_v15 = vpop.permute.xlu0 %47  }
  0x89   :  { %58 = vst.msk [vmem:[%s119_s1 + $0x7] ss:$8 sm:$0xf] %vm8_vm0, %v48_v15  }

// kernel: deconv_block.3
= control target key start
LH: loop header
LB: loop body
LE: loop exit
PB: predicated region body
PF: predicated region fallthrough
CT: control target
= control target key end

     0   :  { %v149_v0 = vmov 0   ;;  %s290_s1 = inlined_call_operand.vmem [shape: f32[32,1], index: 1, kind: input, shape index: {}]   ;;  %s291_s2 = inlined_call_operand.vmem [shape: f32[32,1], index: 2, kind: input, shape index: {}]   ;;  %s292_s0 = inlined_call_operand.vmem [shape: f32[32,512], index: 0, kind: input, shape index: {}, may-alias: {0,3}]   ;;  %s293_s3 = inlined_call_operand.vmem [shape: f32[32,512], index: 3, kind: output, shape index: {}, may-alias: {0,3}]  }
   0x1   :  { %148 = vset.pattern.permute.xlu1 %v149_v0  ;;  %147 = vset.pattern.permute.xlu0 %v149_v0  ;;  %v32_v1 = vld [vmem:[%s290_s1 + $0x10] sm:$0xff]  ;;  %v30_v2 = vld [vmem:[%s290_s1] sm:$0xff]  ;;  %v33_v3 = vld [vmem:[%s290_s1 + $0x18] sm:$0xff] }
   0x2   :  { %46 = vperm.xlu1 %148, %v32_v1   ;;  %36 = vperm.xlu0 %147, %v30_v2   ;;  %v31_v4 = vld [vmem:[%s290_s1 + $0x8] sm:$0xff]  ;;  %v70_v6 = vld [vmem:[%s291_s2] sm:$0xff]  ;;  %v73_v7 = vld [vmem:[%s291_s2 + $0x18] sm:$0xff] }
   0x3   :  { %v71_v5 = vld [vmem:[%s291_s2 + $0x8] sm:$0xff]  ;;  %v72_v8 = vld [vmem:[%s291_s2 + $0x10] sm:$0xff]  ;;  %v14_v11 = vld [vmem:[%s292_s0] sm:$0xff] }
   0x4   :  { %v15_v12 = vld [vmem:[%s292_s0 + $0x8] sm:$0xff]  ;;  %v16_v13 = vld [vmem:[%s292_s0 + $0x10] sm:$0xff]  ;;  %v17_v14 = vld [vmem:[%s292_s0 + $0x18] sm:$0xff] }
   0x5   :  { %v18_v15 = vld [vmem:[%s292_s0 + $0x20] sm:$0xff]  ;;  %v19_v16 = vld [vmem:[%s292_s0 + $0x28] sm:$0xff]  ;;  %v24_v19 = vld [vmem:[%s292_s0 + $0x50] sm:$0xff] }
   0x6   :  { %51 = vperm.xlu1 %148, %v33_v3   ;;  %41 = vperm.xlu0 %147, %v31_v4   ;;  %v22_v17 = vld [vmem:[%s292_s0 + $0x40] sm:$0xff]  ;;  %v23_v18 = vld [vmem:[%s292_s0 + $0x48] sm:$0xff]  ;;  %v25_v20 = vld [vmem:[%s292_s0 + $0x58] sm:$0xff] }
   0x7   :  { %v20_v23 = vld [vmem:[%s292_s0 + $0x30] sm:$0xff]  ;;  %v21_v24 = vld [vmem:[%s292_s0 + $0x38] sm:$0xff]  ;;  %v26_v25 = vld [vmem:[%s292_s0 + $0x60] sm:$0xff] }
   0x8   :  { %v27_v30 = vld [vmem:[%s292_s0 + $0x68] sm:$0xff]  ;;  %v28_v31 = vld [vmem:[%s292_s0 + $0x70] sm:$0xff]  ;;  %v29_v32 = vld [vmem:[%s292_s0 + $0x78] sm:$0xff] }
   0xa   :  { %81 = vperm.xlu1 %148, %v71_v5   ;;  %76 = vperm.xlu0 %147, %v70_v6  }
   0xe   :  { %91 = vperm.xlu1 %148, %v73_v7   ;;  %86 = vperm.xlu0 %147, %v72_v8  }
  0x7d   :  { %v47_v9 = vpop.permute.xlu1 %46  ;;  %v37_v10 = vpop.permute.xlu0 %36 }
  0x7e   :  { %v54_v26 = vmul.f32 %v37_v10, %v14_v11  ;;  %v55_v27 = vmul.f32 %v37_v10, %v15_v12  ;;  %v56_v28 = vmul.f32 %v37_v10, %v16_v13  ;;  %v57_v29 = vmul.f32 %v37_v10, %v17_v14 }
  0x7f   :  { %v62_v33 = vmul.f32 %v47_v9, %v22_v17  ;;  %v63_v34 = vmul.f32 %v47_v9, %v23_v18  ;;  %v64_v35 = vmul.f32 %v47_v9, %v24_v19  ;;  %v65_v36 = vmul.f32 %v47_v9, %v25_v20 }
  0x81   :  { %v52_v21 = vpop.permute.xlu1 %51  ;;  %v42_v22 = vpop.permute.xlu0 %41 }
  0x82   :  { %v58_v37 = vmul.f32 %v42_v22, %v18_v15  ;;  %v59_v38 = vmul.f32 %v42_v22, %v19_v16  ;;  %v60_v39 = vmul.f32 %v42_v22, %v20_v23  ;;  %v61_v40 = vmul.f32 %v42_v22, %v21_v24 }
  0x83   :  { %v66_v43 = vmul.f32 %v52_v21, %v26_v25  ;;  %v67_v44 = vmul.f32 %v52_v21, %v27_v30  ;;  %v68_v45 = vmul.f32 %v52_v21, %v28_v31  ;;  %v69_v46 = vmul.f32 %v52_v21, %v29_v32 }
  0x85   :  { %v82_v41 = vpop.permute.xlu1 %81  ;;  %v77_v42 = vpop.permute.xlu0 %76 }
  0x86   :  { %v98_v47 = vadd.f32 %v82_v41, %v58_v37  ;;  %v99_v48 = vadd.f32 %v82_v41, %v59_v38  ;;  %v100_v49 = vadd.f32 %v82_v41, %v60_v39  ;;  %v101_v50 = vadd.f32 %v82_v41, %v61_v40 }
  0x87   :  { %v94_v51 = vadd.f32 %v77_v42, %v54_v26  ;;  %v95_v52 = vadd.f32 %v77_v42, %v55_v27  ;;  %v96_v53 = vadd.f32 %v77_v42, %v56_v28  ;;  %v97_v54 = vadd.f32 %v77_v42, %v57_v29 }
  0x88   :  { %v114_v55 = vmax.f32 %v98_v47, 0.0  ;;  %v115_v56 = vmax.f32 %v99_v48, 0.0  ;;  %v116_v57 = vmax.f32 %v100_v49, 0.0  ;;  %v117_v58 = vmax.f32 %v101_v50, 0.0 }
  0x89   :  { %v110_v59 = vmax.f32 %v94_v51, 0.0  ;;  %v111_v60 = vmax.f32 %v95_v52, 0.0  ;;  %v112_v61 = vmax.f32 %v96_v53, 0.0  ;;  %v113_v62 = vmax.f32 %v97_v54, 0.0  ;;  %v92_v63 = vpop.permute.xlu1 %91  ;;  %v87_v0 = vpop.permute.xlu0 %86 }
  0x8a   :  { %130 = vst [vmem:[%s293_s3 + $0x20] sm:$0xff] %v114_v55  ;;  %131 = vst [vmem:[%s293_s3 + $0x28] sm:$0xff] %v115_v56  ;;  %v106_v1 = vadd.f32 %v92_v63, %v66_v43  ;;  %v107_v2 = vadd.f32 %v92_v63, %v67_v44  ;;  %v108_v3 = vadd.f32 %v92_v63, %v68_v45 }
  0x8b   :  { %132 = vst [vmem:[%s293_s3 + $0x30] sm:$0xff] %v116_v57  ;;  %133 = vst [vmem:[%s293_s3 + $0x38] sm:$0xff] %v117_v58  ;;  %v109_v4 = vadd.f32 %v92_v63, %v69_v46  ;;  %v102_v5 = vadd.f32 %v87_v0, %v62_v33  ;;  %v103_v6 = vadd.f32 %v87_v0, %v63_v34 }
  0x8c   :  { %126 = vst [vmem:[%s293_s3] sm:$0xff] %v110_v59  ;;  %127 = vst [vmem:[%s293_s3 + $0x8] sm:$0xff] %v111_v60  ;;  %v104_v7 = vadd.f32 %v87_v0, %v64_v35  ;;  %v105_v8 = vadd.f32 %v87_v0, %v65_v36  ;;  %v122_v9 = vmax.f32 %v106_v1, 0.0  ;;  %v123_v10 = vmax.f32 %v107_v2, 0.0 }
  0x8d   :  { %128 = vst [vmem:[%s293_s3 + $0x10] sm:$0xff] %v112_v61  ;;  %129 = vst [vmem:[%s293_s3 + $0x18] sm:$0xff] %v113_v62  ;;  %v124_v11 = vmax.f32 %v108_v3, 0.0  ;;  %v125_v12 = vmax.f32 %v109_v4, 0.0  ;;  %v118_v13 = vmax.f32 %v102_v5, 0.0  ;;  %v119_v14 = vmax.f32 %v103_v6, 0.0 }
  0x8e   :  { %v120_v15 = vmax.f32 %v104_v7, 0.0  ;;  %v121_v16 = vmax.f32 %v105_v8, 0.0  ;;  %138 = vst [vmem:[%s293_s3 + $0x60] sm:$0xff] %v122_v9  ;;  %139 = vst [vmem:[%s293_s3 + $0x68] sm:$0xff] %v123_v10 }
  0x8f   :  { %140 = vst [vmem:[%s293_s3 + $0x70] sm:$0xff] %v124_v11  ;;  %141 = vst [vmem:[%s293_s3 + $0x78] sm:$0xff] %v125_v12 }
  0x90   :  { %134 = vst [vmem:[%s293_s3 + $0x40] sm:$0xff] %v118_v13  ;;  %135 = vst [vmem:[%s293_s3 + $0x48] sm:$0xff] %v119_v14 }
  0x91   :  { %136 = vst [vmem:[%s293_s3 + $0x50] sm:$0xff] %v120_v15  ;;  %137 = vst [vmem:[%s293_s3 + $0x58] sm:$0xff] %v121_v16 }

// kernel: deconv_block.2
= control target key start
LH: loop header
LB: loop body
LE: loop exit
PB: predicated region body
PF: predicated region fallthrough
CT: control target
= control target key end

     0   :  { %vm118_vm0 = vcmask 1041408   ;;  %v764_v3 = vmov 0.0   ;;  %vm105_vm1 = vcmask 146432   ;;  %v765_v17 = vmov 0   ;;  %s1045_s1 = inlined_call_operand.vmem [shape: f32[18,512], index: 1, kind: input, shape index: {}]   ;;  %s1046_s0 = inlined_call_operand.vmem [shape: f32[32,18], index: 0, kind: input, shape index: {}]   ;;  %s1047_s2 = inlined_call_operand.vmem [shape: f32[32,2], index: 2, kind: input, shape index: {}]   ;;  %s1048_s3 = inlined_call_operand.vmem [shape: f32[32,512], index: 3, kind: output, shape index: {0}]   ;;  %s1049_s4 = inlined_call_operand.vmem [shape: f32[1,32,1], index: 4, kind: output, shape index: {1}]   ;;  %s1050_s5 = inlined_call_operand.vmem [shape: f32[1,32,1], index: 5, kind: output, shape index: {2}]  }
   0x1   :  { %v102_v0 = vld [vmem:[%s1045_s1 + $0x48] sm:$0x3]  ;;  %v104_v1 = vld [vmem:[%s1045_s1 + $0x58] sm:$0x3]  ;;  %v101_v2 = vld [vmem:[%s1045_s1 + $0x40] sm:$0x3]  ;;  %195 = vmatprep.mubr.f32.mxu0 %v764_v3  ;;  %284 = vmatprep.mubr.f32.mxu1 %v764_v3  ;;  %v338_v23 = vlaneseq }
   0x2   :  { %743 = vmatprep.subr.msk.mxu0 %vm118_vm0, %v102_v0  ;;  %749 = vmatprep.subr.msk.mxu1 %vm118_vm0, %v104_v1  ;;  %v103_v4 = vld [vmem:[%s1045_s1 + $0x50] sm:$0x3]  ;;  %v98_v5 = vld [vmem:[%s1045_s1 + $0x28] sm:$0xff]  ;;  %v100_v6 = vld [vmem:[%s1045_s1 + $0x38] sm:$0xff]  ;;  %v766_v22 = vmov 1   ;;  %vm658_vm2 = vcmask 7168  }
   0x3   :  { %744 = vmatpush1.msk.msra.mxu0 %vm118_vm0, %v101_v2  ;;  %750 = vmatpush1.msk.msra.mxu1 %vm118_vm0, %v103_v4  ;;  %v97_v7 = vld [vmem:[%s1045_s1 + $0x20] sm:$0xff]  ;;  %v99_v8 = vld [vmem:[%s1045_s1 + $0x30] sm:$0xff]  ;;  %v94_v9 = vld [vmem:[%s1045_s1 + $0x8] sm:$0xff]  ;;  %v339_v24 = vshrl.u32 %v338_v23, 7 }
   0x4   :  { %159 = vmatprep.subr.mxu0 %v98_v5  ;;  %248 = vmatprep.subr.mxu1 %v100_v6  ;;  %v96_v10 = vld [vmem:[%s1045_s1 + $0x18] sm:$0xff]  ;;  %v93_v11 = vld [vmem:[%s1045_s1] sm:$0xff]  ;;  %v95_v12 = vld [vmem:[%s1045_s1 + $0x10] sm:$0xff] }
   0x5   :  { %160 = vmatpush1.msra.mxu0 %v97_v7  ;;  %249 = vmatpush1.msra.mxu1 %v99_v8  ;;  %v89_v13 = vld [vmem:[%s1046_s0] sm:$0xff]  ;;  %v315_v15 = vld [vmem:[%s1047_s2 + $0x10] sm:$0xff]  ;;  %v90_v16 = vld [vmem:[%s1046_s0 + $0x8] sm:$0xff]  ;;  %v340_v25 = vsub.s32 0, %v339_v24  ;;  %v348_v29 = vsub.s32 2, %v339_v24  ;;  %v344_v30 = vsub.s32 1, %v339_v24 }
   0x6   :  { %161 = vmatprep.subr.mxu0 %v94_v9  ;;  %250 = vmatprep.subr.mxu1 %v96_v10  ;;  %v313_v14 = vld [vmem:[%s1047_s2] sm:$0xff]  ;;  %v314_v18 = vld [vmem:[%s1047_s2 + $0x8] sm:$0xff]  ;;  %v316_v19 = vld [vmem:[%s1047_s2 + $0x18] sm:$0xff]  ;;  %v352_v31 = vsub.s32 3, %v339_v24 }
   0x7   :  { %162 = vmatpush1.msra.mxu0 %v93_v11  ;;  %251 = vmatpush1.msra.mxu1 %v95_v12  ;;  %v91_v20 = vld [vmem:[%s1046_s0 + $0x10] sm:$0xff]  ;;  %v92_v21 = vld [vmem:[%s1046_s0 + $0x18] sm:$0xff] }
   0x8   :  { %745 = vmatmul.mubr.msk.f32.vlgmr.msra.gmra.mxu0 %vm105_vm1, %v89_v13  ;;  %751 = vmatmul.mubr.msk.f32.vlgmr.msra.gmra.mxu1 %vm105_vm1, %v89_v13  ;;  %v755_v28 = vld [vmem:[%s1045_s1 + $0x40] ss:$8 sm:$0xf]  ;;  %v756_v38 = vld [vmem:[%s1045_s1 + $0x41] ss:$8 sm:$0xf] }
   0x9   :  { %201 = vmatprep.mubr.f32.mxu0 %v764_v3  ;;  %290 = vmatprep.mubr.f32.mxu1 %v764_v3  ;;  %v341_v32 = vrot.slane %v755_v28, %v340_v25  ;;  %v349_v33 = vrot.slane %v755_v28, %v348_v29  ;;  %v345_v34 = vrot.slane %v755_v28, %v344_v30 }
   0xa   :  { %760 = vset.pattern.permute.xlu0 %v765_v17  ;;  %761 = vset.pattern.permute.xlu1 %v765_v17  ;;  %v353_v35 = vrot.slane %v755_v28, %v352_v31  ;;  %v426_v45 = vrot.slane %v756_v38, %v340_v25  ;;  %v434_v46 = vrot.slane %v756_v38, %v348_v29 }
   0xb   :  { %319 = vperm.xlu0 %760, %v313_v14   ;;  %329 = vperm.xlu1 %761, %v315_v15   ;;  %v430_v49 = vrot.slane %v756_v38, %v344_v30  ;;  %v881_v50 = vrot.slane %v756_v38, %v352_v31 }
   0xc   :  { %746 = vmatmul.mubr.msk.f32.gmra.mxu0 %vm105_vm1, %v90_v16  ;;  %752 = vmatmul.mubr.msk.f32.gmra.mxu1 %vm105_vm1, %v90_v16 }
   0xd   :  { %207 = vmatprep.mubr.f32.mxu0 %v764_v3  ;;  %296 = vmatprep.mubr.f32.mxu1 %v764_v3 }
   0xf   :  { %324 = vperm.xlu0 %760, %v314_v18   ;;  %334 = vperm.xlu1 %761, %v316_v19  }
  0x10   :  { %747 = vmatmul.mubr.msk.f32.gmra.mxu0 %vm105_vm1, %v91_v20  ;;  %753 = vmatmul.mubr.msk.f32.gmra.mxu1 %vm105_vm1, %v91_v20 }
  0x11   :  { %213 = vmatprep.mubr.f32.mxu0 %v764_v3  ;;  %302 = vmatprep.mubr.f32.mxu1 %v764_v3 }
  0x13   :  { %762 = vset.pattern.permute.xlu0 %v766_v22  ;;  %763 = vset.pattern.permute.xlu1 %v766_v22 }
  0x14   :  { %748 = vmatmul.mubr.msk.f32.gmra.mxu0 %vm105_vm1, %v92_v21  ;;  %754 = vmatmul.mubr.msk.f32.gmra.mxu1 %vm105_vm1, %v92_v21 }
  0x15   :  { %407 = vperm.xlu0 %762, %v313_v14   ;;  %411 = vperm.xlu1 %763, %v314_v18  }
  0x19   :  { %419 = vperm.xlu0 %762, %v316_v19   ;;  %415 = vperm.xlu1 %763, %v315_v15  }
  0x86   :  { %v320_v26 = vpop.permute.xlu0 %319  ;;  %v330_v27 = vpop.permute.xlu1 %329 }
  0x87   :  { %v358_v39 = vmul.f32 %v341_v32, %v320_v26  ;;  %v360_v40 = vmul.f32 %v349_v33, %v320_v26  ;;  %v871_v41 = vmul.f32 %v345_v34, %v320_v26  ;;  %v873_v42 = vmul.f32 %v353_v35, %v320_v26 }
  0x88   :  { %v875_v43 = vmul.f32 %v341_v32, %v330_v27  ;;  %v877_v44 = vmul.f32 %v349_v33, %v330_v27  ;;  %v879_v47 = vmul.f32 %v345_v34, %v330_v27  ;;  %v883_v51 = vmul.f32 %v353_v35, %v330_v27 }
  0x89   :  { %v374_v48 = vsub.f32 1.0, %v358_v39  ;;  %v376_v53 = vsub.f32 1.0, %v360_v40  ;;  %v375_v55 = vsub.f32 1.0, %v871_v41  ;;  %v377_v56 = vsub.f32 1.0, %v873_v42 }
  0x8a   :  { %v325_v36 = vpop.permute.xlu0 %324  ;;  %v335_v37 = vpop.permute.xlu1 %334  ;;  %v382_v57 = vsub.f32 1.0, %v875_v43  ;;  %v384_v61 = vsub.f32 1.0, %v877_v44  ;;  %v383_v63 = vsub.f32 1.0, %v879_v47  ;;  %v385_v3 = vsub.f32 1.0, %v883_v51 }
  0x8b   :  { %v888_v58 = vmul.f32 %v341_v32, %v325_v36  ;;  %v890_v59 = vmul.f32 %v349_v33, %v325_v36  ;;  %v892_v60 = vmul.f32 %v345_v34, %v325_v36  ;;  %v895_v62 = vmul.f32 %v353_v35, %v325_v36 }
  0x8c   :  { %v898_v0 = vmul.f32 %v341_v32, %v335_v37  ;;  %v900_v1 = vmul.f32 %v349_v33, %v335_v37  ;;  %v903_v4 = vmul.f32 %v345_v34, %v335_v37  ;;  %v905_v5 = vmul.f32 %v353_v35, %v335_v37 }
  0x8d   :  { %v378_v10 = vsub.f32 1.0, %v888_v58  ;;  %v380_v11 = vsub.f32 1.0, %v890_v59  ;;  %v379_v13 = vsub.f32 1.0, %v892_v60  ;;  %v381_v16 = vsub.f32 1.0, %v895_v62 }
  0x8e   :  { %v386_v17 = vsub.f32 1.0, %v898_v0  ;;  %v388_v18 = vsub.f32 1.0, %v900_v1  ;;  %v387_v21 = vsub.f32 1.0, %v903_v4  ;;  %v389_v22 = vsub.f32 1.0, %v905_v5 }
  0x90   :  { %v408_v52 = vpop.permute.xlu0 %407  ;;  %v412_v54 = vpop.permute.xlu1 %411 }
  0x91   :  { %v443_v2 = vmul.f32 %v426_v45, %v408_v52  ;;  %v445_v6 = vmul.f32 %v434_v46, %v408_v52  ;;  %v444_v7 = vmul.f32 %v430_v49, %v408_v52  ;;  %v446_v8 = vmul.f32 %v881_v50, %v408_v52 }
  0x92   :  { %v447_v9 = vmul.f32 %v426_v45, %v412_v54  ;;  %v910_v12 = vmul.f32 %v434_v46, %v412_v54  ;;  %v913_v15 = vmul.f32 %v430_v49, %v412_v54  ;;  %v450_v20 = vmul.f32 %v881_v50, %v412_v54 }
  0x93   :  { %v459_v19 = vsub.f32 1.0, %v443_v2  ;;  %v461_v23 = vsub.f32 1.0, %v445_v6  ;;  %v460_v25 = vsub.f32 1.0, %v444_v7  ;;  %v462_v26 = vsub.f32 1.0, %v446_v8 }
  0x94   :  { %v416_v14 = vpop.permute.xlu1 %415  ;;  %v420_v24 = vpop.permute.xlu0 %419  ;;  %v463_v27 = vsub.f32 1.0, %v447_v9  ;;  %v465_v30 = vsub.f32 1.0, %v910_v12  ;;  %v464_v36 = vsub.f32 1.0, %v913_v15  ;;  %v466_v40 = vsub.f32 1.0, %v450_v20 }
  0x95   :  { %v922_v31 = vmul.f32 %v426_v45, %v416_v14  ;;  %v924_v32 = vmul.f32 %v434_v46, %v416_v14  ;;  %v926_v33 = vmul.f32 %v430_v49, %v416_v14  ;;  %v930_v37 = vmul.f32 %v881_v50, %v416_v14 }
  0x96   :  { %v932_v41 = vmul.f32 %v426_v45, %v420_v24  ;;  %v934_v42 = vmul.f32 %v434_v46, %v420_v24  ;;  %v936_v52 = vmul.f32 %v430_v49, %v420_v24  ;;  %v942_v7 = vmul.f32 %v881_v50, %v420_v24 }
  0x97   :  { %v467_v62 = vsub.f32 1.0, %v922_v31  ;;  %v469_v2 = vsub.f32 1.0, %v924_v32  ;;  %v468_v6 = vsub.f32 1.0, %v926_v33 }
  0x98   :  { %v471_v12 = vsub.f32 1.0, %v932_v41  ;;  %v473_v50 = vsub.f32 1.0, %v934_v42  ;;  %v472_v14 = vsub.f32 1.0, %v936_v52 }
  0xc8   :  { %v197_v28 = vpop.f32.mrf.mxu0  ;;  %v286_v29 = vpop.f32.mrf.mxu1 }
  0xc9   :  { %v390_v34 = vmul.f32 %v374_v48, %v197_v28  ;;  %v392_v35 = vmul.f32 %v376_v53, %v286_v29  ;;  %v474_v28 = vsub.f32 1.0, %v942_v7 }
  0xca   :  { %v199_v38 = vpop.f32.mrf.mxu0  ;;  %v288_v39 = vpop.f32.mrf.mxu1 }
  0xcb   :  { %v475_v54 = vmul.f32 %v459_v19, %v390_v34  ;;  %v477_v58 = vmul.f32 %v461_v23, %v392_v35  ;;  %v391_v59 = vmul.f32 %v375_v55, %v199_v38  ;;  %v393_v60 = vmul.f32 %v377_v56, %v288_v39 }
  0xcc   :  { %v203_v48 = vpop.f32.mrf.mxu0  ;;  %v292_v53 = vpop.f32.mrf.mxu1  ;;  %v470_v55 = vsub.f32 1.0, %v930_v37 }
  0xcd   :  { %491 = vst [vmem:[%s1048_s3] sm:$0xff] %v475_v54  ;;  %493 = vst [vmem:[%s1048_s3 + $0x10] sm:$0xff] %v477_v58  ;;  %v476_v45 = vmul.f32 %v460_v25, %v391_v59  ;;  %v478_v46 = vmul.f32 %v462_v26, %v393_v60  ;;  %v394_v49 = vmul.f32 %v378_v10, %v203_v48 }
  0xce   :  { %v396_v56 = vmul.f32 %v380_v11, %v292_v53  ;;  %v205_v8 = vpop.f32.mrf.mxu0  ;;  %v294_v9 = vpop.f32.mrf.mxu1  ;;  %v571_v20 = vmul.f32 %v475_v54, %v475_v54  ;;  %v573_v33 = vmul.f32 %v477_v58, %v477_v58 }
  0xcf   :  { %492 = vst [vmem:[%s1048_s3 + $0x8] sm:$0xff] %v476_v45  ;;  %v572_v15 = vmul.f32 %v476_v45, %v476_v45  ;;  %494 = vst [vmem:[%s1048_s3 + $0x18] sm:$0xff] %v478_v46  ;;  %v479_v10 = vmul.f32 %v463_v27, %v394_v49  ;;  %v395_v19 = vmul.f32 %v379_v13, %v205_v8 }
  0xd0   :  { %v397_v11 = vmul.f32 %v381_v16, %v294_v9  ;;  %v481_v23 = vmul.f32 %v465_v30, %v396_v56  ;;  %v209_v24 = vpop.f32.mrf.mxu0  ;;  %v298_v25 = vpop.f32.mrf.mxu1  ;;  %v638_v26 = vadd.f32 %v476_v45, %v475_v54  ;;  %v574_v34 = vmul.f32 %v478_v46, %v478_v46 }
  0xd1   :  { %495 = vst [vmem:[%s1048_s3 + $0x20] sm:$0xff] %v479_v10  ;;  %v480_v29 = vmul.f32 %v464_v36, %v395_v19  ;;  %v398_v32 = vmul.f32 %v382_v57, %v209_v24  ;;  %v400_v13 = vmul.f32 %v384_v61, %v298_v25  ;;  %v679_v35 = vadd.f32 %v572_v15, %v571_v20 }
  0xd2   :  { %v482_v31 = vmul.f32 %v466_v40, %v397_v11  ;;  %497 = vst [vmem:[%s1048_s3 + $0x30] sm:$0xff] %v481_v23  ;;  %v211_v16 = vpop.f32.mrf.mxu0  ;;  %v300_v27 = vpop.f32.mrf.mxu1  ;;  %v639_v30 = vadd.f32 %v638_v26, %v477_v58  ;;  %v575_v42 = vmul.f32 %v479_v10, %v479_v10  ;;  %v577_v60 = vmul.f32 %v481_v23, %v481_v23 }
  0xd3   :  { %496 = vst [vmem:[%s1048_s3 + $0x28] sm:$0xff] %v480_v29  ;;  %v576_v36 = vmul.f32 %v480_v29, %v480_v29  ;;  %v483_v43 = vmul.f32 %v467_v62, %v398_v32  ;;  %v399_v57 = vmul.f32 %v383_v63, %v211_v16  ;;  %v401_v44 = vmul.f32 %v385_v3, %v300_v27 }
  0xd4   :  { %498 = vst [vmem:[%s1048_s3 + $0x38] sm:$0xff] %v482_v31  ;;  %v485_v61 = vmul.f32 %v469_v2, %v400_v13  ;;  %v215_v37 = vpop.f32.mrf.mxu0  ;;  %v304_v38 = vpop.f32.mrf.mxu1  ;;  %v640_v39 = vadd.f32 %v639_v30, %v478_v46  ;;  %v680_v40 = vadd.f32 %v679_v35, %v573_v33  ;;  %v643_v41 = vadd.f32 %v480_v29, %v479_v10 }
  0xd5   :  { %499 = vst [vmem:[%s1048_s3 + $0x40] sm:$0xff] %v483_v43  ;;  %v484_v52 = vmul.f32 %v468_v6, %v399_v57  ;;  %v486_v54 = vmul.f32 %v470_v55, %v401_v44  ;;  %v402_v47 = vmul.f32 %v386_v17, %v215_v37  ;;  %v404_v51 = vmul.f32 %v388_v18, %v304_v38 }
  0xd6   :  { %501 = vst [vmem:[%s1048_s3 + $0x50] sm:$0xff] %v485_v61  ;;  %641 = vadd.xlane.f32.xlu1 %v640_v39  ;;  %v217_v63 = vpop.f32.mrf.mxu0  ;;  %v306_v3 = vpop.f32.mrf.mxu1  ;;  %v681_v58 = vadd.f32 %v680_v40, %v574_v34  ;;  %v644_v59 = vadd.f32 %v643_v41, %v481_v23  ;;  %v579_v18 = vmul.f32 %v483_v43, %v483_v43 }
  0xd7   :  { %500 = vst [vmem:[%s1048_s3 + $0x48] sm:$0xff] %v484_v52  ;;  %v580_v48 = vmul.f32 %v484_v52, %v484_v52  ;;  %502 = vst [vmem:[%s1048_s3 + $0x58] sm:$0xff] %v486_v54  ;;  %v487_v0 = vmul.f32 %v471_v12, %v402_v47  ;;  %v403_v1 = vmul.f32 %v387_v21, %v217_v63 }
  0xd8   :  { %v405_v17 = vmul.f32 %v389_v22, %v306_v3  ;;  %v489_v53 = vmul.f32 %v473_v50, %v404_v51  ;;  %682 = vadd.xlane.f32.xlu0 %v681_v58  ;;  %v684_v62 = vadd.f32 %v576_v36, %v575_v42  ;;  %v648_v2 = vadd.f32 %v484_v52, %v483_v43 }
  0xd9   :  { %503 = vst [vmem:[%s1048_s3 + $0x60] sm:$0xff] %v487_v0  ;;  %v488_v6 = vmul.f32 %v472_v14, %v403_v1  ;;  %v578_v45 = vmul.f32 %v482_v31, %v482_v31  ;;  %v645_v4 = vadd.f32 %v644_v59, %v482_v31  ;;  %v689_v22 = vadd.f32 %v580_v48, %v579_v18 }
  0xda   :  { %v490_v7 = vmul.f32 %v474_v28, %v405_v17  ;;  %505 = vst [vmem:[%s1048_s3 + $0x70] sm:$0xff] %v489_v53  ;;  %v685_v21 = vadd.f32 %v684_v62, %v577_v60  ;;  %v649_v5 = vadd.f32 %v648_v2, %v485_v61  ;;  %v583_v46 = vmul.f32 %v487_v0, %v487_v0 }
  0xdb   :  { %504 = vst [vmem:[%s1048_s3 + $0x68] sm:$0xff] %v488_v6  ;;  %v584_v49 = vmul.f32 %v488_v6, %v488_v6  ;;  %v653_v55 = vadd.f32 %v488_v6, %v487_v0  ;;  %v581_v8 = vmul.f32 %v485_v61, %v485_v61  ;;  %v585_v15 = vmul.f32 %v489_v53, %v489_v53 }
  0xdc   :  { %506 = vst [vmem:[%s1048_s3 + $0x78] sm:$0xff] %v490_v7  ;;  %646 = vadd.xlane.f32.xlu0 %v645_v4  ;;  %v686_v56 = vadd.f32 %v685_v21, %v578_v45  ;;  %v650_v50 = vadd.f32 %v649_v5, %v486_v54  ;;  %v582_v19 = vmul.f32 %v486_v54, %v486_v54 }
  0xdd   :  { %v654_v9 = vadd.f32 %v653_v55, %v489_v53  ;;  %v694_v12 = vadd.f32 %v584_v49, %v583_v46  ;;  %v690_v14 = vadd.f32 %v689_v22, %v581_v8  ;;  %v586_v23 = vmul.f32 %v490_v7, %v490_v7 }
  0xde   :  { %687 = vadd.xlane.f32.xlu1 %v686_v56 }
  0xdf   :  { %v655_v10 = vadd.f32 %v654_v9, %v490_v7  ;;  %v695_v11 = vadd.f32 %v694_v12, %v585_v15  ;;  %v691_v20 = vadd.f32 %v690_v14, %v582_v19 }
  0xe0   :  { %651 = vadd.xlane.f32.xlu0 %v650_v50 }
  0xe1   :  { %v696_v24 = vadd.f32 %v695_v11, %v586_v23 }
  0xe2   :  { %656 = vadd.xlane.f32.xlu1 %v655_v10 }
  0xe4   :  { %692 = vadd.xlane.f32.xlu0 %v691_v20 }
  0xe6   :  { %697 = vadd.xlane.f32.xlu1 %v696_v24 }
 0x15f   :  { %v642_v25 = vpop.xlane.xlu1 %641 }
 0x160   :  { %659 = vst.msk [vmem:[%s1049_s4] sm:$0xff] %vm658_vm2, %v642_v25 }
 0x161   :  { %v683_v26 = vpop.xlane.xlu0 %682 }
 0x162   :  { %699 = vst.msk [vmem:[%s1050_s5] sm:$0xff] %vm658_vm2, %v683_v26 }
 0x165   :  { %v647_v28 = vpop.xlane.xlu0 %646 }
 0x166   :  { %660 = vst.msk [vmem:[%s1049_s4 + $0x8] sm:$0xff] %vm658_vm2, %v647_v28 }
 0x167   :  { %v688_v29 = vpop.xlane.xlu1 %687 }
 0x168   :  { %700 = vst.msk [vmem:[%s1050_s5 + $0x8] sm:$0xff] %vm658_vm2, %v688_v29 }
 0x169   :  { %v652_v31 = vpop.xlane.xlu0 %651 }
 0x16a   :  { %661 = vst.msk [vmem:[%s1049_s4 + $0x10] sm:$0xff] %vm658_vm2, %v652_v31 }
 0x16b   :  { %v657_v32 = vpop.xlane.xlu1 %656 }
 0x16c   :  { %662 = vst.msk [vmem:[%s1049_s4 + $0x18] sm:$0xff] %vm658_vm2, %v657_v32 }
 0x16d   :  { %v693_v33 = vpop.xlane.xlu0 %692 }
 0x16e   :  { %701 = vst.msk [vmem:[%s1050_s5 + $0x10] sm:$0xff] %vm658_vm2, %v693_v33 }
 0x16f   :  { %v698_v13 = vpop.xlane.xlu1 %697 }
 0x170   :  { %702 = vst.msk [vmem:[%s1050_s5 + $0x18] sm:$0xff] %vm658_vm2, %v698_v13 }

</bundles_post_ra>
